<compile_context>
chip_gen: v7x
topology: tpu7x:2x2x1
jax: 0.10.0
libtpu: 0.0.40
codegen_flags: <defaults>
</compile_context>

<pallas_src>
import jax
import jax.numpy as jnp
from jax.experimental import pallas as pl
from jax.experimental.pallas import tpu as pltpu

D_IN = 768     # pre_net input features
D_HID = 256    # pre_net output features


# --------------------------------------------------------------------------
# Kernel: pre_net + ReLU + padding-masked mean pool for BB batch elements.
# --------------------------------------------------------------------------
def _prenet_pool_kernel(x_ref, w1_ref, b1_ref, pooled_ref):
    bb, t, _ = x_ref.shape
    x3 = x_ref[...]                                           # [BB, T, 768]

    # padding_mask = (|x|.sum(-1) == 0); keep the "valid" (non-padding) mask
    abs_sum = jnp.sum(jnp.abs(x3), axis=-1, keepdims=True)    # [BB, T, 1]
    valid = (abs_sum != 0.0).astype(jnp.float32)              # [BB, T, 1]
    denom = jnp.sum(valid, axis=1)                            # [BB, 1]

    # one big MXU matmul over all BB*T rows (f32 accumulation)
    x2 = x3.reshape(bb * t, D_IN)                             # [BB*T, 768]
    h = jnp.dot(x2, w1_ref[...], preferred_element_type=jnp.float32)
    h = jnp.maximum(h + b1_ref[...], 0.0)                     # [BB*T, 256]

    # mask padded positions and mean-pool over the sequence axis
    h3 = h.reshape(bb, t, D_HID) * valid                      # [BB, T, 256]
    pooled = jnp.sum(h3, axis=1) / denom                      # [BB, 256]
    # (0/0 -> NaN for all-padding sequences, matching the torch semantics)

    pooled_ref[...] = pooled[:, None, :].astype(pooled_ref.dtype)


def _choose_block_batch(B, T):
    """Largest batch block that (a) divides B, (b) keeps the double-buffered
    streaming input block under ~16 MiB (safe for v7x's 64 MiB VMEM), and
    (c) leaves >= 2 grid steps when possible (so v7x's 2 TCs both get work)."""
    per_elem = 2 * T * D_IN * 4          # double-buffered f32 input per batch elem
    max_bb = max(1, (16 << 20) // per_elem)
    divisors = [d for d in range(1, B + 1) if B % d == 0 and d <= max_bb]
    preferred = [d for d in divisors if B // d >= 2]
    return max(preferred) if preferred else max(divisors)


# --------------------------------------------------------------------------
# Wrapper
# --------------------------------------------------------------------------
@jax.jit
def bert_style_finetune_forward(style_embed, params):
    """style_embed: [B, T, 768] float32. Returns dict matching the torch module."""
    B, T, D = style_embed.shape
    assert D == D_IN
    bb = _choose_block_batch(B, T)

    cost = pl.CostEstimate(
        flops=2 * B * T * D_IN * D_HID,
        transcendentals=0,
        bytes_accessed=(B * T * D_IN + D_IN * D_HID + D_HID + B * D_HID) * 4,
    )

    pooled3 = pl.pallas_call(
        _prenet_pool_kernel,
        out_shape=jax.ShapeDtypeStruct((B, 1, D_HID), jnp.float32),
        grid_spec=pltpu.PrefetchScalarGridSpec(
            num_scalar_prefetch=0,
            grid=(B // bb,),
            in_specs=[
                pl.BlockSpec((bb, T, D_IN), lambda b: (b, 0, 0)),
                pl.BlockSpec((D_IN, D_HID), lambda b: (0, 0)),
                pl.BlockSpec((1, D_HID), lambda b: (0, 0)),
            ],
            out_specs=pl.BlockSpec((bb, 1, D_HID), lambda b: (b, 0, 0)),
        ),
        compiler_params=pltpu.CompilerParams(
            dimension_semantics=("parallel",),
            vmem_limit_bytes=48 << 20,
        ),
        cost_estimate=cost,
    )(style_embed, params["pre_net_w"], params["pre_net_b"])

    pooled = pooled3[:, 0, :]                                 # [B, 256]

    # Tiny head matmuls (256 -> 8/3/3/3): plain XLA; keeping them out of the
    # kernel avoids non-lane-dense (sub-128) Pallas output stores.
    return {
        "pooling_embed": pooled,
        "emotion_logits": pooled @ params["emotion_w"] + params["emotion_b"],
        "pitch_logits": pooled @ params["pitch_w"] + params["pitch_b"],
        "dur_logits": pooled @ params["dur_w"] + params["dur_b"],
        "energy_logits": pooled @ params["energy_w"] + params["energy_b"],
    }


# --------------------------------------------------------------------------
# Deterministic synthetic parameters (PyTorch nn.Linear-style uniform init)
# --------------------------------------------------------------------------
def init_params(key):
    ks = jax.random.split(key, 10)

    def linear(kw, kb, fan_in, fan_out):
        bound = 1.0 / jnp.sqrt(fan_in)
        w = jax.random.uniform(kw, (fan_in, fan_out), jnp.float32, -bound, bound)
        b = jax.random.uniform(kb, (fan_out,), jnp.float32, -bound, bound)
        return w, b

    w1, b1 = linear(ks[0], ks[1], D_IN, D_HID)
    we, be = linear(ks[2], ks[3], D_HID, 8)    # emotion_head
    wp, bp = linear(ks[4], ks[5], D_HID, 3)    # pitch_head
    wd, bd = linear(ks[6], ks[7], D_HID, 3)    # dur_head
    wg, bg = linear(ks[8], ks[9], D_HID, 3)    # energy_head

    return {
        "pre_net_w": w1,
        "pre_net_b": b1.reshape(1, D_HID),
        "emotion_w": we, "emotion_b": be,
        "pitch_w": wp, "pitch_b": bp,
        "dur_w": wd, "dur_b": bd,
        "energy_w": wg, "energy_b": bg,
    }


def reference_forward(style_embed, params):
    """Pure-JAX reference mirroring the torch module, for verification."""
    x = style_embed
    padding_mask = (jnp.sum(jnp.abs(x), axis=-1) == 0).astype(jnp.float32)  # [B,T]
    h = jnp.maximum(x @ params["pre_net_w"] + params["pre_net_b"], 0.0)
    h = h * (1.0 - padding_mask)[..., None]
    pooled = jnp.sum(h, axis=1) / jnp.sum(1.0 - padding_mask, axis=1, keepdims=True)
    return {
        "pooling_embed": pooled,
        "emotion_logits": pooled @ params["emotion_w"] + params["emotion_b"],
        "pitch_logits": pooled @ params["pitch_w"] + params["pitch_b"],
        "dur_logits": pooled @ params["dur_w"] + params["dur_b"],
        "energy_logits": pooled @ params["energy_w"] + params["energy_b"],
    }


if __name__ == "__main__":
    key = jax.random.PRNGKey(0)
    k_param, k_data = jax.random.split(key)

    params = init_params(k_param)

    B, T = 4, 8
    style_embed = jax.random.normal(k_data, (B, T, D_IN), jnp.float32)
    # make some trailing timesteps padding (all-zero) to exercise the mask
    style_embed = style_embed.at[1, T - 3:, :].set(0.0)
    style_embed = style_embed.at[3, T - 5:, :].set(0.0)

    out = bert_style_finetune_forward(style_embed, params)
    out = jax.tree_util.tree_map(jax.block_until_ready, out)

    ref = reference_forward(style_embed, params)
    for name in ("pooling_embed", "emotion_logits", "pitch_logits",
                 "dur_logits", "energy_logits"):
        assert out[name].shape == ref[name].shape, name
        assert jnp.allclose(out[name], ref[name], atol=1e-4, rtol=1e-4), name

    print("KERNEL_OK")
</pallas_src>

<mosaic_0001>
module attributes {stable_mosaic.version = 11 : i64} {
  func.func @_prenet_pool_kernel(%arg0: i32, %arg1: memref<2x8x768xf32, #tpu.memory_space<vmem>>, %arg2: memref<768x256xf32, #tpu.memory_space<vmem>>, %arg3: memref<1x256xf32, #tpu.memory_space<vmem>>, %arg4: memref<2x1x256xf32, #tpu.memory_space<vmem>>) attributes {dimension_semantics = [#tpu.dimension_semantics<parallel>], iteration_bounds = array<i64: 2>, scalar_prefetch = 0 : i64, scratch_operands = 0 : i64, tpu.core_type = #tpu.core_type<tc>, window_params = [{transform_indices = @transform_0, window_bounds = array<i64: 2, 8, 768>}, {pipeline_mode = #tpu.pipeline_mode<synchronous>, transform_indices = @transform_1, window_bounds = array<i64: 768, 256>}, {pipeline_mode = #tpu.pipeline_mode<synchronous>, transform_indices = @transform_2, window_bounds = array<i64: 1, 256>}, {transform_indices = @transform_3, window_bounds = array<i64: 2, 1, 256>}]} {
    %c0 = arith.constant 0 : index
    %c0_0 = arith.constant 0 : index
    %c0_1 = arith.constant 0 : index
    %0 = vector.load %arg1[%c0, %c0_0, %c0_1] : memref<2x8x768xf32, #tpu.memory_space<vmem>>, vector<2x8x768xf32>
    %1 = math.absf %0 : vector<2x8x768xf32>
    %cst = arith.constant dense<0.000000e+00> : vector<2x8xf32>
    %2 = vector.multi_reduction <add>, %1, %cst [2] : vector<2x8x768xf32> to vector<2x8xf32>
    %3 = vector.shape_cast %2 : vector<2x8xf32> to vector<2x8x1xf32>
    %cst_2 = arith.constant 0.000000e+00 : f32
    %4 = vector.broadcast %cst_2 : f32 to vector<2x8x1xf32>
    %5 = arith.cmpf one, %3, %4 : vector<2x8x1xf32>
    %6 = arith.extui %5 : vector<2x8x1xi1> to vector<2x8x1xi32>
    %7 = arith.sitofp %6 : vector<2x8x1xi32> to vector<2x8x1xf32>
    %cst_3 = arith.constant dense<0.000000e+00> : vector<2x1xf32>
    %8 = vector.multi_reduction <add>, %7, %cst_3 [1] : vector<2x8x1xf32> to vector<2x1xf32>
    %9 = vector.shape_cast %0 : vector<2x8x768xf32> to vector<16x768xf32>
    %c0_4 = arith.constant 0 : index
    %c0_5 = arith.constant 0 : index
    %10 = vector.load %arg2[%c0_4, %c0_5] : memref<768x256xf32, #tpu.memory_space<vmem>>, vector<768x256xf32>
    %cst_6 = arith.constant dense<0.000000e+00> : vector<16x256xf32>
    %11 = tpu.matmul %9, %10, %cst_6 {dimension_numbers = #tpu.dot_dimension_numbers<[1], [0], [0], [1], [0, 0, 1, 1], [], []>} : vector<16x768xf32>, vector<768x256xf32>, vector<16x256xf32> -> vector<16x256xf32>
    %c0_7 = arith.constant 0 : index
    %c0_8 = arith.constant 0 : index
    %12 = vector.load %arg3[%c0_7, %c0_8] : memref<1x256xf32, #tpu.memory_space<vmem>>, vector<1x256xf32>
    %13 = vector.broadcast %12 : vector<1x256xf32> to vector<16x256xf32>
    %14 = arith.addf %11, %13 : vector<16x256xf32>
    %cst_9 = arith.constant 0.000000e+00 : f32
    %15 = vector.broadcast %cst_9 : f32 to vector<16x256xf32>
    %16 = arith.maximumf %14, %15 : vector<16x256xf32>
    %17 = vector.shape_cast %16 : vector<16x256xf32> to vector<2x8x256xf32>
    %18 = vector.broadcast %7 : vector<2x8x1xf32> to vector<2x8x256xf32>
    %19 = arith.mulf %17, %18 : vector<2x8x256xf32>
    %cst_10 = arith.constant dense<0.000000e+00> : vector<2x256xf32>
    %20 = vector.multi_reduction <add>, %19, %cst_10 [1] : vector<2x8x256xf32> to vector<2x256xf32>
    %21 = vector.broadcast %8 : vector<2x1xf32> to vector<2x256xf32>
    %22 = arith.divf %20, %21 : vector<2x256xf32>
    %23 = vector.shape_cast %22 : vector<2x256xf32> to vector<2x1x256xf32>
    %c0_11 = arith.constant 0 : index
    %c0_12 = arith.constant 0 : index
    %c0_13 = arith.constant 0 : index
    %24 = vector.load %arg4[%c0_11, %c0_12, %c0_13] : memref<2x1x256xf32, #tpu.memory_space<vmem>>, vector<2x1x256xf32>
    tpu.vector_store %arg4[%c0_11, %c0_12, %c0_13], %23 {strides = array<i32>} : memref<2x1x256xf32, #tpu.memory_space<vmem>>, vector<2x1x256xf32>,
    return
  }
  func.func @transform_0(%arg0: i32) -> (i32, i32, i32) {
    %c0_i32 = arith.constant 0 : i32
    %c0_i32_0 = arith.constant 0 : i32
    %c0_i32_1 = arith.constant 0 : i32
    return %arg0, %c0_i32, %c0_i32_0 : i32, i32, i32
  }
  func.func @transform_1(%arg0: i32) -> (i32, i32) {
    %c0_i32 = arith.constant 0 : i32
    %c0_i32_0 = arith.constant 0 : i32
    %c0_i32_1 = arith.constant 0 : i32
    return %c0_i32, %c0_i32_0 : i32, i32
  }
  func.func @transform_2(%arg0: i32) -> (i32, i32) {
    %c0_i32 = arith.constant 0 : i32
    %c0_i32_0 = arith.constant 0 : i32
    %c0_i32_1 = arith.constant 0 : i32
    return %c0_i32, %c0_i32_0 : i32, i32
  }
  func.func @transform_3(%arg0: i32) -> (i32, i32, i32) {
    %c0_i32 = arith.constant 0 : i32
    %c0_i32_0 = arith.constant 0 : i32
    %c0_i32_1 = arith.constant 0 : i32
    return %arg0, %c0_i32, %c0_i32_0 : i32, i32, i32
  }
}

</mosaic_0001>

<bundles_post_ra>
// kernel: bert_style_finetune_forward.1
= control target key start
LH: loop header
LB: loop body
LE: loop exit
PB: predicated region body
PF: predicated region fallthrough
CT: control target
= control target key end

     0   :  { %8 = vsyncpa [#allocation3], 0  ;;  %s1483_s0 = inlined_call_operand.hbm [shape: f32[4,8,768], index: 0, kind: input, shape index: {}]   ;;  %s1484_s1 = inlined_call_operand.hbm [shape: f32[768,256], index: 1, kind: input, shape index: {}]   ;;  %s1485_s2 = inlined_call_operand.vmem [shape: f32[1,256], index: 2, kind: input, shape index: {}]   ;;  %s1486_s3 = inlined_call_operand.vmem [shape: f32[4,1,256], index: 3, kind: output, shape index: {}]  }
   0x1   :  { %10 = vsyncpa [#allocation3 + $0x1], 0 }
   0x2   :  { %11 = vsyncpa [#allocation5], 0  ;;  %s1298_s12 = smov 0   ;;  %s1300_s13 = smov 0  }
   0x3   :  { %s1302_s14 = smov 0   ;;  %s1304_s15 = smov 0  }
   0x4 LB: > { %s857_s16 = sadd.s32 4294967295, %s1268_s15   ;;  %p37_p0 = scmp.ne.s32.totalorder %s1260_s13, %s1256_s12  ;;  %s1268_s15 = sphi %s1304_s15, %s1502_s15   ;;  %s1264_s14 = sphi %s1302_s14, %s1501_s14   ;;  %s1260_s13 = sphi %s1300_s13, %s1500_s13   ;;  %s1256_s12 = sphi %s1298_s12, %s1499_s12  }
   0x5   : > { %p1320_p1 = scmp.eq.s32.totalorder %s857_s16, 0  ;;  %p859_p2 = scmp.ge.s32.totalorder %s1268_s15, 1 }
   0x6   : > { %p116_p3 = scmp.lt.s32.totalorder %s1268_s15, 3  ;;  %s1270_s20 = smov [#allocation4]  }
   0x7   : > { %s1491_s17 = scalar_select %p1320_p1, 1, 0 }
   0x8   : > { %p1328_p4 = por %p1320_p1, %p37_p0  ;;  %p1332_p5 = pnand %p859_p2, %p116_p3 }
   0x9   : > { %s128_s21 = sshll.u32 %s1270_s20, 4  ;;  %s1345_s23 = sadd.s32 1, %s1268_s15   ;;  %s129_s21 = int_to_ptr.vmem [resolvable:$true] %s128_s21 }
   0xa   : > { %s1492_s18 = scalar_select %p1328_p4, 1, 0 }
   0xb   : > { %s1493_s19 = scalar_select %p1332_p5, 1, 0 }
   0xc   : > { %p1118_p6 = pneg %p1332_p5  ;;  %s24_s24 = sadd.s32 1, %s1264_s14 }
   0xd   : > { %s21_s25 = ssub.s32 %s1268_s15, %s1345_s23  ;;  %s1172_s28 = scalar_lea.hbm %s1484_s1, 24576 }
   0xe   : > { %p1340_p7 = pnand %p1118_p6, %p1320_p1  ;;  %p1173_p8 = scmp.ne.s32.totalorder %s1484_s1, %s1172_s28 }
   0xf   : > { %p1179_p12 = scmp.lt.u32.totalorder %s1172_s28, %s1484_s1 }
  0x10   : > { %p1174_p9 = pneg %p1340_p7 }
  0x12   : > { %p1175_p10 = pnand %p1174_p9, %p1173_p8 }
  0x14   : > { %p1176_p11 = pneg %p1175_p10 }
  0x16   : > { %p1181_p13 = pnand %p1179_p12, %p1176_p11 }
  0x18   : > { %1184 = shalt.err (!%p1181_p13)
}
  0x19   : > { %s1185_s6 = scalar_lea.vmem %s129_s21, 24576  ;;  %p1193_p6 = scmp.lt.s32.totalorder %s129_s21, %s129_s21 }
  0x1a   : > { %p1186_p0 = scmp.ne.s32.totalorder %s129_s21, %s1185_s6  ;;  %p1194_p1 = scmp.lt.s32.totalorder %s1185_s6, %s1185_s6 }
  0x1c   : > { %p1188_p2 = pnand %p1186_p0, %p1174_p9  ;;  %p1195_p4 = por %p1194_p1, %p1193_p6 }
  0x1e   : > { %p1189_p3 = pneg %p1188_p2 }
  0x20   : > { %p1196_p5 = pnand %p1195_p4, %p1189_p3 }
  0x22   : > { %1199 = shalt.err (!%p1196_p5)
}
  0x23   : > { %s1271_s7 = smov 256   ;;  %s1272_s8 = smov 16  }
  0x24   : > { %1121 = dma.hbm_to_vmem [thread:$0]  (!%p1340_p7), %s1484_s1, 24576, %s129_s21, [#allocation5], %s1271_s7, %s1271_s7, %s1272_s8  }
  0x25   : > { %p22_p8 = scmp.eq.s32.totalorder %s21_s25, 0  ;;  %p31_p9 = scmp.ne.s32.totalorder %s1264_s14, %s1260_s13 }
  0x26   : > { %p32_p1 = scmp.eq.s32.totalorder %s1268_s15, 0  ;;  %p1127_p4 = scmp.lt.s32.totalorder %s1268_s15, 2 }
  0x27   : > { %s1371_s11 = scalar_select %p22_p8, %s1264_s14, %s24_s24  }
  0x28   : > { %p33_p5 = por %p32_p1, %p31_p9  ;;  %s145_s12 = sand.u32 1, %s1264_s14  }
  0x29   : > { %s1109_s20 = smul.u32 96, %s145_s12  ;;  %s1386_s29 = scalar_lea.sflag [#allocation3], %s145_s12 }
  0x2a   : > { %s1110_s26 = smul.u32 1536, %s1268_s15  ;;  %p1375_p10 = pnand %p1127_p4, %p33_p5 }
  0x2b   : > { %s149_s24 = scalar_lea.vmem [#allocation2], %s1109_s20  ;;  %s1205_s6 = scalar_lea.hbm %s1483_s0, 3072 }
  0x2c   : > { %s1382_s21 = scalar_lea.hbm %s1483_s0, %s1110_s26  ;;  %s157_s25 = sshll.u32 %s149_s24, 4  ;;  %s1384_s25 = int_to_ptr.vmem [resolvable:$true] %s157_s25 }
  0x2d   : > { %s1200_s30 = scalar_lea.hbm %s1382_s21, 1536  ;;  %p1202_p11 = pneg %p1375_p10 }
  0x2e   : > { %p1201_p7 = scmp.ne.s32.totalorder %s1382_s21, %s1200_s30  ;;  %p1206_p0 = scmp.lt.u32.totalorder %s1382_s21, %s1483_s0 }
  0x2f   : > { %p1207_p2 = scmp.lt.u32.totalorder %s1205_s6, %s1200_s30  ;;  %p1209_p6 = scmp.lt.u32.totalorder %s1200_s30, %s1382_s21 }
  0x30   : > { %p1203_p12 = pnand %p1202_p11, %p1201_p7 }
  0x31   : > { %p1208_p3 = por %p1207_p2, %p1206_p0 }
  0x32   : > { %p1204_p13 = pneg %p1203_p12 }
  0x33   : > { %p1210_p8 = por %p1209_p6, %p1208_p3 }
  0x35   : > { %p1211_p9 = pnand %p1210_p8, %p1204_p13 }
  0x37   : > { %1214 = shalt.err (!%p1211_p9)
}
  0x38   : > { %s1215_s9 = scalar_lea.vmem %s1384_s25, 1536  ;;  %s1273_s10 = smov [#allocation2]  }
  0x39   : > { %p1216_p1 = scmp.ne.s32.totalorder %s1384_s25, %s1215_s9  ;;  %s1220_s12 = sshll.u32 %s1273_s10, 4  ;;  %s1221_s12 = int_to_ptr.vmem [resolvable:$false] %s1220_s12 }
  0x3a   : > { %s1222_s20 = scalar_lea.vmem %s1221_s12, 3072  ;;  %p1223_p7 = scmp.lt.s32.totalorder %s1384_s25, %s1221_s12 }
  0x3b   : > { %p1218_p4 = pnand %p1216_p1, %p1202_p11  ;;  %p1224_p12 = scmp.lt.s32.totalorder %s1222_s20, %s1215_s9 }
  0x3d   : > { %p1219_p5 = pneg %p1218_p4  ;;  %p1225_p0 = por %p1224_p12, %p1223_p7 }
  0x3f   : > { %p1226_p2 = pnand %p1225_p0, %p1219_p5 }
  0x41   : > { %1229 = shalt.err (!%p1226_p2)
}
  0x42   : > { %s1274_s26 = smov 768   ;;  %s1275_s28 = smov 48  }
  0x43   : > { %1125 = dma.hbm_to_vmem [thread:$0]  (!%p1375_p10), %s1382_s21, 1536, %s1384_s25, %s1386_s29, %s1274_s26, %s1274_s26, %s1275_s28  }
  0x44   : > { %p1496_p11 = scmp.ne.s32.totalorder %s1493_s19, 0 }
  0x45   : > { %s171_s22 = sand.u32 (!%p1496_p11), 1, %s1260_s13   ;;  %p1497_p13 = scmp.ne.s32.totalorder (!%p1496_p11), %s1492_s18, 0 }
  0x46   : > { %169 = sbr.rel (%p1496_p11) target bundleno = 454 (0x1c6), region = 32  ;;  %s172_s30 = scalar_lea.sflag (!%p1496_p11), [#allocation3], %s171_s22 }
  0x47   : > { %s1111_s24 = smul.u32 (!%p1496_p11), 96, %s171_s22 }
  0x49   : > { %s1417_s4 = scalar_lea.vmem (!%p1496_p11), [#allocation2], %s1111_s24 }
  0x4d   : > { %1247 = dma.done.wait (%p1497_p13), %s172_s30, 1536  }
  0x4e   : > { %1249 = vsyncadd (%p1497_p13), %s172_s30, 4294965760  ;;  %p1498_p3 = scmp.ne.s32.totalorder %s1491_s17, 0 }
  0x50   : > { %1251 = dma.done.wait (%p1498_p3), [#allocation5], 24576  }
  0x51   : > { %1253 = vsyncadd (%p1498_p3), [#allocation5], 4294942720  ;;  %v266_v0 = vld [vmem:[#allocation4 + $0x8] sm:$0xff]  ;;  %v268_v1 = vld [vmem:[#allocation4 + $0x18] sm:$0xff]  ;;  %s867_s19 = sshll.u32 %s857_s16, 1 }
  0x52   : > { %v330_v2 = vld [vmem:[#allocation4 + $0x208] sm:$0xff]  ;;  %v873_v3 = vpack.c.bf16 %v268_v1, %v266_v0  ;;  %v332_v4 = vld [vmem:[#allocation4 + $0x218] sm:$0xff]  ;;  %v265_v5 = vld [vmem:[#allocation4] sm:$0xff]  ;;  %p204_p10 = scmp.lt.s32.totalorder %s867_s19, 3 }
  0x53   : > { %v267_v6 = vld [vmem:[#allocation4 + $0x10] sm:$0xff]  ;;  %v937_v7 = vpack.c.bf16 %v332_v4, %v330_v2  ;;  %v329_v9 = vld [vmem:[#allocation4 + $0x200] sm:$0xff]  ;;  %v270_v11 = vld [vmem:[#allocation4 + $0x28] sm:$0xff] }
  0x54   : > { %v875_v8 = vpack.c.bf16 %v267_v6, %v265_v5  ;;  %v331_v10 = vld [vmem:[#allocation4 + $0x210] sm:$0xff]  ;;  %874 = vmatprep.subr.bf16.mxu1 %v873_v3  ;;  %v272_v13 = vld [vmem:[#allocation4 + $0x38] sm:$0xff]  ;;  %v334_v14 = vld [vmem:[#allocation4 + $0x228] sm:$0xff]  ;;  %s1504_s19 = smov (!%p204_p10, %s867_s19), 3 }
  0x55   : > { %v939_v12 = vpack.c.bf16 %v331_v10, %v329_v9  ;;  %v336_v15 = vld [vmem:[#allocation4 + $0x238] sm:$0xff]  ;;  %938 = vmatprep.subr.bf16.mxu0 %v937_v7  ;;  %v877_v16 = vpack.c.bf16 %v272_v13, %v270_v11  ;;  %v269_v18 = vld [vmem:[#allocation4 + $0x20] sm:$0xff]  ;;  %v271_v19 = vld [vmem:[#allocation4 + $0x30] sm:$0xff]  ;;  %s868_s15 = sshll.u32 %s1504_s19, 1 }
  0x56   : > { %876 = vmatpush1.bf16.msra.mxu1 %v875_v8  ;;  %v941_v17 = vpack.c.bf16 %v336_v15, %v334_v14  ;;  %v333_v20 = vld [vmem:[#allocation4 + $0x220] sm:$0xff]  ;;  %v879_v21 = vpack.c.bf16 %v271_v19, %v269_v18  ;;  %v335_v22 = vld [vmem:[#allocation4 + $0x230] sm:$0xff]  ;;  %v274_v23 = vld [vmem:[#allocation4 + $0x48] sm:$0xff]  ;;  %s207_s21 = scalar_lea.vmem %s1486_s3, %s868_s15 }
  0x57   : > { %940 = vmatpush1.bf16.msra.mxu0 %v939_v12  ;;  %v276_v24 = vld [vmem:[#allocation4 + $0x58] sm:$0xff]  ;;  %878 = vmatprep.subr.bf16.mxu1 %v877_v16  ;;  %v943_v25 = vpack.c.bf16 %v335_v22, %v333_v20  ;;  %v338_v27 = vld [vmem:[#allocation4 + $0x248] sm:$0xff]  ;;  %v273_v29 = vld [vmem:[#allocation4 + $0x40] sm:$0xff] }
  0x58   : > { %942 = vmatprep.subr.bf16.mxu0 %v941_v17  ;;  %v881_v26 = vpack.c.bf16 %v276_v24, %v274_v23  ;;  %v340_v28 = vld [vmem:[#allocation4 + $0x258] sm:$0xff]  ;;  %v275_v31 = vld [vmem:[#allocation4 + $0x50] sm:$0xff]  ;;  %v337_v32 = vld [vmem:[#allocation4 + $0x240] sm:$0xff] }
  0x59   : > { %v945_v30 = vpack.c.bf16 %v340_v28, %v338_v27  ;;  %v339_v33 = vld [vmem:[#allocation4 + $0x250] sm:$0xff]  ;;  %v883_v34 = vpack.c.bf16 %v275_v31, %v273_v29  ;;  %v278_v35 = vld [vmem:[#allocation4 + $0x68] sm:$0xff]  ;;  %v280_v36 = vld [vmem:[#allocation4 + $0x78] sm:$0xff] }
  0x5a   : > { %880 = vmatpush1.bf16.msra.mxu1 %v879_v21  ;;  %v342_v37 = vld [vmem:[#allocation4 + $0x268] sm:$0xff]  ;;  %v947_v38 = vpack.c.bf16 %v339_v33, %v337_v32  ;;  %v885_v39 = vpack.c.bf16 %v280_v36, %v278_v35  ;;  %v344_v40 = vld [vmem:[#allocation4 + $0x278] sm:$0xff]  ;;  %v277_v41 = vld [vmem:[#allocation4 + $0x60] sm:$0xff] }
  0x5b   : > { %944 = vmatpush1.bf16.msra.mxu0 %v943_v25  ;;  %882 = vmatprep.subr.bf16.mxu1 %v881_v26  ;;  %v279_v42 = vld [vmem:[#allocation4 + $0x70] sm:$0xff]  ;;  %v949_v43 = vpack.c.bf16 %v344_v40, %v342_v37  ;;  %v341_v44 = vld [vmem:[#allocation4 + $0x260] sm:$0xff]  ;;  %v282_v46 = vld [vmem:[#allocation4 + $0x88] sm:$0xff] }
  0x5c   : > { %946 = vmatprep.subr.bf16.mxu0 %v945_v30  ;;  %v343_v45 = vld [vmem:[#allocation4 + $0x270] sm:$0xff]  ;;  %v284_v47 = vld [vmem:[#allocation4 + $0x98] sm:$0xff]  ;;  %v346_v48 = vld [vmem:[#allocation4 + $0x288] sm:$0xff]  ;;  %v887_v50 = vpack.c.bf16 %v279_v42, %v277_v41 }
  0x5d   : > { %v348_v49 = vld [vmem:[#allocation4 + $0x298] sm:$0xff]  ;;  %v951_v51 = vpack.c.bf16 %v343_v45, %v341_v44  ;;  %v889_v52 = vpack.c.bf16 %v284_v47, %v282_v46  ;;  %v281_v53 = vld [vmem:[#allocation4 + $0x80] sm:$0xff]  ;;  %v283_v54 = vld [vmem:[#allocation4 + $0x90] sm:$0xff] }
  0x5e   : > { %884 = vmatpush1.bf16.msra.mxu1 %v883_v34  ;;  %v345_v55 = vld [vmem:[#allocation4 + $0x280] sm:$0xff]  ;;  %v953_v56 = vpack.c.bf16 %v348_v49, %v346_v48  ;;  %v347_v57 = vld [vmem:[#allocation4 + $0x290] sm:$0xff]  ;;  %v286_v58 = vld [vmem:[#allocation4 + $0xa8] sm:$0xff]  ;;  %v891_v62 = vpack.c.bf16 %v283_v54, %v281_v53 }
  0x5f   : > { %948 = vmatpush1.bf16.msra.mxu0 %v947_v38  ;;  %886 = vmatprep.subr.bf16.mxu1 %v885_v39  ;;  %v288_v59 = vld [vmem:[#allocation4 + $0xb8] sm:$0xff]  ;;  %v350_v60 = vld [vmem:[#allocation4 + $0x2a8] sm:$0xff]  ;;  %v955_v63 = vpack.c.bf16 %v347_v57, %v345_v55  ;;  %v285_v1 = vld [vmem:[#allocation4 + $0xa0] sm:$0xff] }
  0x60   : > { %950 = vmatprep.subr.bf16.mxu0 %v949_v43  ;;  %v352_v61 = vld [vmem:[#allocation4 + $0x2b8] sm:$0xff]  ;;  %v893_v0 = vpack.c.bf16 %v288_v59, %v286_v58  ;;  %v287_v2 = vld [vmem:[#allocation4 + $0xb0] sm:$0xff]  ;;  %v349_v3 = vld [vmem:[#allocation4 + $0x2a0] sm:$0xff] }
  0x61   : > { %v957_v4 = vpack.c.bf16 %v352_v61, %v350_v60  ;;  %v351_v5 = vld [vmem:[#allocation4 + $0x2b0] sm:$0xff]  ;;  %v290_v6 = vld [vmem:[#allocation4 + $0xc8] sm:$0xff]  ;;  %v292_v7 = vld [vmem:[#allocation4 + $0xd8] sm:$0xff]  ;;  %v895_v10 = vpack.c.bf16 %v287_v2, %v285_v1 }
  0x62   : > { %888 = vmatpush1.bf16.msra.mxu1 %v887_v50  ;;  %v354_v8 = vld [vmem:[#allocation4 + $0x2c8] sm:$0xff]  ;;  %v356_v9 = vld [vmem:[#allocation4 + $0x2d8] sm:$0xff]  ;;  %v959_v11 = vpack.c.bf16 %v351_v5, %v349_v3  ;;  %v897_v12 = vpack.c.bf16 %v292_v7, %v290_v6  ;;  %v289_v13 = vld [vmem:[#allocation4 + $0xc0] sm:$0xff] }
  0x63   : > { %952 = vmatpush1.bf16.msra.mxu0 %v951_v51  ;;  %890 = vmatprep.subr.bf16.mxu1 %v889_v52  ;;  %v291_v14 = vld [vmem:[#allocation4 + $0xd0] sm:$0xff]  ;;  %v353_v15 = vld [vmem:[#allocation4 + $0x2c0] sm:$0xff]  ;;  %v961_v16 = vpack.c.bf16 %v356_v9, %v354_v8  ;;  %v294_v18 = vld [vmem:[#allocation4 + $0xe8] sm:$0xff] }
  0x64   : > { %954 = vmatprep.subr.bf16.mxu0 %v953_v56  ;;  %v355_v17 = vld [vmem:[#allocation4 + $0x2d0] sm:$0xff]  ;;  %v296_v19 = vld [vmem:[#allocation4 + $0xf8] sm:$0xff]  ;;  %v358_v20 = vld [vmem:[#allocation4 + $0x2e8] sm:$0xff]  ;;  %v899_v22 = vpack.c.bf16 %v291_v14, %v289_v13 }
  0x65   : > { %v360_v21 = vld [vmem:[#allocation4 + $0x2f8] sm:$0xff]  ;;  %v963_v23 = vpack.c.bf16 %v355_v17, %v353_v15  ;;  %v901_v24 = vpack.c.bf16 %v296_v19, %v294_v18  ;;  %v293_v25 = vld [vmem:[#allocation4 + $0xe0] sm:$0xff]  ;;  %v295_v26 = vld [vmem:[#allocation4 + $0xf0] sm:$0xff] }
  0x66   : > { %892 = vmatpush1.bf16.msra.mxu1 %v891_v62  ;;  %v357_v27 = vld [vmem:[#allocation4 + $0x2e0] sm:$0xff]  ;;  %v965_v28 = vpack.c.bf16 %v360_v21, %v358_v20  ;;  %v359_v29 = vld [vmem:[#allocation4 + $0x2f0] sm:$0xff]  ;;  %v298_v30 = vld [vmem:[#allocation4 + $0x108] sm:$0xff]  ;;  %v903_v34 = vpack.c.bf16 %v295_v26, %v293_v25 }
  0x67   : > { %956 = vmatpush1.bf16.msra.mxu0 %v955_v63  ;;  %894 = vmatprep.subr.bf16.mxu1 %v893_v0  ;;  %v300_v31 = vld [vmem:[#allocation4 + $0x118] sm:$0xff]  ;;  %v362_v32 = vld [vmem:[#allocation4 + $0x308] sm:$0xff]  ;;  %v967_v35 = vpack.c.bf16 %v359_v29, %v357_v27  ;;  %v297_v37 = vld [vmem:[#allocation4 + $0x100] sm:$0xff] }
  0x68   : > { %958 = vmatprep.subr.bf16.mxu0 %v957_v4  ;;  %v364_v33 = vld [vmem:[#allocation4 + $0x318] sm:$0xff]  ;;  %v905_v36 = vpack.c.bf16 %v300_v31, %v298_v30  ;;  %v299_v38 = vld [vmem:[#allocation4 + $0x110] sm:$0xff]  ;;  %v361_v39 = vld [vmem:[#allocation4 + $0x300] sm:$0xff] }
  0x69   : > { %v969_v40 = vpack.c.bf16 %v364_v33, %v362_v32  ;;  %v363_v41 = vld [vmem:[#allocation4 + $0x310] sm:$0xff]  ;;  %v302_v42 = vld [vmem:[#allocation4 + $0x128] sm:$0xff]  ;;  %v304_v43 = vld [vmem:[#allocation4 + $0x138] sm:$0xff]  ;;  %v907_v46 = vpack.c.bf16 %v299_v38, %v297_v37 }
  0x6a   : > { %896 = vmatpush1.bf16.msra.mxu1 %v895_v10  ;;  %v366_v44 = vld [vmem:[#allocation4 + $0x328] sm:$0xff]  ;;  %v368_v45 = vld [vmem:[#allocation4 + $0x338] sm:$0xff]  ;;  %v971_v47 = vpack.c.bf16 %v363_v41, %v361_v39  ;;  %v909_v48 = vpack.c.bf16 %v304_v43, %v302_v42  ;;  %v301_v49 = vld [vmem:[#allocation4 + $0x120] sm:$0xff] }
  0x6b   : > { %960 = vmatpush1.bf16.msra.mxu0 %v959_v11  ;;  %898 = vmatprep.subr.bf16.mxu1 %v897_v12  ;;  %v303_v50 = vld [vmem:[#allocation4 + $0x130] sm:$0xff]  ;;  %v365_v51 = vld [vmem:[#allocation4 + $0x320] sm:$0xff]  ;;  %v973_v52 = vpack.c.bf16 %v368_v45, %v366_v44  ;;  %v306_v54 = vld [vmem:[#allocation4 + $0x148] sm:$0xff] }
  0x6c   : > { %962 = vmatprep.subr.bf16.mxu0 %v961_v16  ;;  %v367_v53 = vld [vmem:[#allocation4 + $0x330] sm:$0xff]  ;;  %v308_v55 = vld [vmem:[#allocation4 + $0x158] sm:$0xff]  ;;  %v370_v56 = vld [vmem:[#allocation4 + $0x348] sm:$0xff]  ;;  %v911_v58 = vpack.c.bf16 %v303_v50, %v301_v49 }
  0x6d   : > { %v372_v57 = vld [vmem:[#allocation4 + $0x358] sm:$0xff]  ;;  %v975_v59 = vpack.c.bf16 %v367_v53, %v365_v51  ;;  %v913_v60 = vpack.c.bf16 %v308_v55, %v306_v54  ;;  %v305_v61 = vld [vmem:[#allocation4 + $0x140] sm:$0xff]  ;;  %v307_v62 = vld [vmem:[#allocation4 + $0x150] sm:$0xff] }
  0x6e   : > { %900 = vmatpush1.bf16.msra.mxu1 %v899_v22  ;;  %v369_v63 = vld [vmem:[#allocation4 + $0x340] sm:$0xff]  ;;  %v977_v0 = vpack.c.bf16 %v372_v57, %v370_v56  ;;  %v371_v1 = vld [vmem:[#allocation4 + $0x350] sm:$0xff]  ;;  %v310_v2 = vld [vmem:[#allocation4 + $0x168] sm:$0xff]  ;;  %v915_v6 = vpack.c.bf16 %v307_v62, %v305_v61 }
  0x6f   : > { %964 = vmatpush1.bf16.msra.mxu0 %v963_v23  ;;  %902 = vmatprep.subr.bf16.mxu1 %v901_v24  ;;  %v312_v3 = vld [vmem:[#allocation4 + $0x178] sm:$0xff]  ;;  %v374_v4 = vld [vmem:[#allocation4 + $0x368] sm:$0xff]  ;;  %v309_v7 = vld [vmem:[#allocation4 + $0x160] sm:$0xff]  ;;  %v979_v8 = vpack.c.bf16 %v371_v1, %v369_v63 }
  0x70   : > { %966 = vmatprep.subr.bf16.mxu0 %v965_v28  ;;  %v376_v5 = vld [vmem:[#allocation4 + $0x378] sm:$0xff]  ;;  %v917_v9 = vpack.c.bf16 %v312_v3, %v310_v2  ;;  %v311_v10 = vld [vmem:[#allocation4 + $0x170] sm:$0xff]  ;;  %v373_v11 = vld [vmem:[#allocation4 + $0x360] sm:$0xff] }
  0x71   : > { %v375_v12 = vld [vmem:[#allocation4 + $0x370] sm:$0xff]  ;;  %v981_v13 = vpack.c.bf16 %v376_v5, %v374_v4  ;;  %v314_v14 = vld [vmem:[#allocation4 + $0x188] sm:$0xff]  ;;  %v316_v15 = vld [vmem:[#allocation4 + $0x198] sm:$0xff]  ;;  %v919_v20 = vpack.c.bf16 %v311_v10, %v309_v7 }
  0x72   : > { %904 = vmatpush1.bf16.msra.mxu1 %v903_v34  ;;  %v1428_v16 = vld [vmem:[%s1417_s4 + $0x8] sm:$0xff]  ;;  %v380_v18 = vld [vmem:[#allocation4 + $0x398] sm:$0xff]  ;;  %v983_v21 = vpack.c.bf16 %v375_v12, %v373_v11  ;;  %v921_v22 = vpack.c.bf16 %v316_v15, %v314_v14  ;;  %v313_v23 = vld [vmem:[#allocation4 + $0x180] sm:$0xff] }
  0x73   : > { %968 = vmatpush1.bf16.msra.mxu0 %v967_v35  ;;  %906 = vmatprep.subr.bf16.mxu1 %v905_v36  ;;  %v378_v17 = vld [vmem:[#allocation4 + $0x388] sm:$0xff]  ;;  %v1432_v19 = vld [vmem:[%s1417_s4 + $0x18] sm:$0xff]  ;;  %v315_v24 = vld [vmem:[#allocation4 + $0x190] sm:$0xff]  ;;  %v222_v57 = vand.u32 2147483647, %v1428_v16 }
  0x74   : > { %970 = vmatprep.subr.bf16.mxu0 %v969_v40  ;;  %533 = vmatprep.mubr.f32.mxu1 %v1428_v16  ;;  %v377_v25 = vld [vmem:[#allocation4 + $0x380] sm:$0xff]  ;;  %v985_v26 = vpack.c.bf16 %v380_v18, %v378_v17  ;;  %v379_v27 = vld [vmem:[#allocation4 + $0x390] sm:$0xff]  ;;  %v318_v28 = vld [vmem:[#allocation4 + $0x1a8] sm:$0xff]  ;;  %v923_v32 = vpack.c.bf16 %v315_v24, %v313_v23  ;;  %v224_v15 = vand.u32 2147483647, %v1432_v19 }
  0x75   : > { %610 = vmatprep.mubr.f32.mxu0 %v1432_v19  ;;  %v320_v29 = vld [vmem:[#allocation4 + $0x1b8] sm:$0xff]  ;;  %v382_v30 = vld [vmem:[#allocation4 + $0x3a8] sm:$0xff]  ;;  %v987_v33 = vpack.c.bf16 %v379_v27, %v377_v25  ;;  %v317_v35 = vld [vmem:[#allocation4 + $0x1a0] sm:$0xff] }
  0x76   : > { %908 = vmatpush1.bf16.msra.mxu1 %v907_v46  ;;  %v384_v31 = vld [vmem:[#allocation4 + $0x3b8] sm:$0xff]  ;;  %v925_v34 = vpack.c.bf16 %v320_v29, %v318_v28  ;;  %v319_v36 = vld [vmem:[#allocation4 + $0x1b0] sm:$0xff]  ;;  %v381_v37 = vld [vmem:[#allocation4 + $0x3a0] sm:$0xff] }
  0x77   : > { %972 = vmatpush1.bf16.msra.mxu0 %v971_v47  ;;  %910 = vmatprep.subr.bf16.mxu1 %v909_v48  ;;  %v989_v38 = vpack.c.bf16 %v384_v31, %v382_v30  ;;  %v383_v39 = vld [vmem:[#allocation4 + $0x3b0] sm:$0xff]  ;;  %v322_v40 = vld [vmem:[#allocation4 + $0x1c8] sm:$0xff]  ;;  %v324_v41 = vld [vmem:[#allocation4 + $0x1d8] sm:$0xff]  ;;  %v927_v44 = vpack.c.bf16 %v319_v36, %v317_v35 }
  0x78   : > { %974 = vmatprep.subr.bf16.mxu0 %v973_v52  ;;  %v386_v42 = vld [vmem:[#allocation4 + $0x3c8] sm:$0xff]  ;;  %v388_v43 = vld [vmem:[#allocation4 + $0x3d8] sm:$0xff]  ;;  %v321_v45 = vld [vmem:[#allocation4 + $0x1c0] sm:$0xff]  ;;  %v991_v46 = vpack.c.bf16 %v383_v39, %v381_v37  ;;  %v929_v47 = vpack.c.bf16 %v324_v41, %v322_v40 }
  0x79   : > { %v323_v48 = vld [vmem:[#allocation4 + $0x1d0] sm:$0xff]  ;;  %v385_v49 = vld [vmem:[#allocation4 + $0x3c0] sm:$0xff]  ;;  %v993_v51 = vpack.c.bf16 %v388_v43, %v386_v42  ;;  %v326_v52 = vld [vmem:[#allocation4 + $0x1e8] sm:$0xff] }
  0x7a   : > { %912 = vmatpush1.bf16.msra.mxu1 %v911_v58  ;;  %v387_v50 = vld [vmem:[#allocation4 + $0x3d0] sm:$0xff]  ;;  %v328_v53 = vld [vmem:[#allocation4 + $0x1f8] sm:$0xff]  ;;  %v209_v54 = vld [vmem:[%s1417_s4] sm:$0xff] }
  0x7b   : > { %976 = vmatpush1.bf16.msra.mxu0 %v975_v59  ;;  %914 = vmatprep.subr.bf16.mxu1 %v913_v60  ;;  %v390_v55 = vld [vmem:[#allocation4 + $0x3e8] sm:$0xff]  ;;  %v392_v56 = vld [vmem:[#allocation4 + $0x3f8] sm:$0xff]  ;;  %v221_v58 = vand.u32 2147483647, %v209_v54  ;;  %v931_v59 = vpack.c.bf16 %v323_v48, %v321_v45  ;;  %v325_v60 = vld [vmem:[#allocation4 + $0x1e0] sm:$0xff]  ;;  %v995_v61 = vpack.c.bf16 %v387_v50, %v385_v49  ;;  %v933_v62 = vpack.c.bf16 %v328_v53, %v326_v52 }
  0x7c   : > { %978 = vmatprep.subr.bf16.mxu0 %v977_v0  ;;  %v327_v63 = vld [vmem:[#allocation4 + $0x1f0] sm:$0xff]  ;;  %v389_v0 = vld [vmem:[#allocation4 + $0x3e0] sm:$0xff]  ;;  %v997_v2 = vpack.c.bf16 %v392_v56, %v390_v55  ;;  %v394_v3 = vld [vmem:[#allocation4 + $0x408] sm:$0xff] }
  0x7d   : > { %v391_v1 = vld [vmem:[#allocation4 + $0x3f0] sm:$0xff]  ;;  %v396_v4 = vld [vmem:[#allocation4 + $0x418] sm:$0xff]  ;;  %v393_v11 = vld [vmem:[#allocation4 + $0x400] sm:$0xff] }
  0x7e   : > { %916 = vmatpush1.bf16.msra.mxu1 %v915_v6  ;;  %v211_v5 = vld [vmem:[%s1417_s4 + $0x10] sm:$0xff]  ;;  %v233_v6 = vadd.f32 %v222_v57, %v221_v58  ;;  %v1001_v10 = vpack.c.bf16 %v396_v4, %v394_v3  ;;  %v400_v14 = vld [vmem:[#allocation4 + $0x438] sm:$0xff]  ;;  %v402_v25 = vld [vmem:[#allocation4 + $0x448] sm:$0xff] }
  0x7f   : > { %980 = vmatpush1.bf16.msra.mxu0 %v979_v8  ;;  %918 = vmatprep.subr.bf16.mxu1 %v917_v9  ;;  %v223_v7 = vand.u32 2147483647, %v211_v5  ;;  %v935_v8 = vpack.c.bf16 %v327_v63, %v325_v60  ;;  %v999_v9 = vpack.c.bf16 %v391_v1, %v389_v0  ;;  %v395_v12 = vld [vmem:[#allocation4 + $0x410] sm:$0xff]  ;;  %v216_v17 = vld [vmem:[%s1417_s4 + $0x38] sm:$0xff]  ;;  %v217_v28 = vld [vmem:[%s1417_s4 + $0x40] sm:$0xff] }
  0x80   : > { %982 = vmatprep.subr.bf16.mxu0 %v981_v13  ;;  %v398_v13 = vld [vmem:[#allocation4 + $0x428] sm:$0xff]  ;;  %v1003_v18 = vpack.c.bf16 %v395_v12, %v393_v11  ;;  %v215_v23 = vld [vmem:[%s1417_s4 + $0x30] sm:$0xff]  ;;  %v229_v29 = vand.u32 2147483647, %v217_v28  ;;  %v401_v30 = vld [vmem:[#allocation4 + $0x440] sm:$0xff] }
  0x81   : > { %v234_v16 = vadd.f32 %v233_v6, %v223_v7  ;;  %v1005_v24 = vpack.c.bf16 %v400_v14, %v398_v13  ;;  %v227_v27 = vand.u32 2147483647, %v215_v23  ;;  %v218_v19 = vld [vmem:[%s1417_s4 + $0x48] sm:$0xff]  ;;  %v403_v31 = vld [vmem:[#allocation4 + $0x450] sm:$0xff]  ;;  %v408_v45 = vld [vmem:[#allocation4 + $0x478] sm:$0xff] }
  0x82   : > { %920 = vmatpush1.bf16.msra.mxu1 %v919_v20  ;;  %v397_v20 = vld [vmem:[#allocation4 + $0x420] sm:$0xff]  ;;  %v214_v37 = vld [vmem:[%s1417_s4 + $0x28] sm:$0xff]  ;;  %v1448_v39 = vld [vmem:[%s1417_s4 + $0x50] sm:$0xff]  ;;  %v1011_v50 = vpack.c.bf16 %v403_v31, %v401_v30 }
  0x83   : > { %984 = vmatpush1.bf16.msra.mxu0 %v983_v21  ;;  %922 = vmatprep.subr.bf16.mxu1 %v921_v22  ;;  %v399_v21 = vld [vmem:[#allocation4 + $0x430] sm:$0xff]  ;;  %v228_v22 = vand.u32 2147483647, %v216_v17  ;;  %v226_v42 = vand.u32 2147483647, %v214_v37  ;;  %v405_v52 = vld [vmem:[#allocation4 + $0x460] sm:$0xff] }
  0x84   : > { %986 = vmatprep.subr.bf16.mxu0 %v985_v26  ;;  %v404_v26 = vld [vmem:[#allocation4 + $0x458] sm:$0xff]  ;;  %v1007_v35 = vpack.c.bf16 %v399_v21, %v397_v20  ;;  %v231_v43 = vand.u32 2147483647, %v1448_v39  ;;  %v407_v53 = vld [vmem:[#allocation4 + $0x470] sm:$0xff]  ;;  %v410_v56 = vld [vmem:[#allocation4 + $0x488] sm:$0xff] }
  0x85   : > { %v1009_v36 = vpack.c.bf16 %v404_v26, %v402_v25  ;;  %v412_v57 = vld [vmem:[#allocation4 + $0x498] sm:$0xff]  ;;  %v414_v63 = vld [vmem:[#allocation4 + $0x4a8] sm:$0xff]  ;;  %v413_v3 = vld [vmem:[#allocation4 + $0x4a0] sm:$0xff] }
  0x86   : > { %924 = vmatpush1.bf16.msra.mxu1 %v923_v32  ;;  %v240_v32 = vadd.f32 %v228_v22, %v227_v27  ;;  %v1017_v60 = vpack.c.bf16 %v412_v57, %v410_v56  ;;  %v416_v0 = vld [vmem:[#allocation4 + $0x4b8] sm:$0xff]  ;;  %v415_v4 = vld [vmem:[#allocation4 + $0x4b0] sm:$0xff]  ;;  %v422_v11 = vld [vmem:[#allocation4 + $0x4e8] sm:$0xff] }
  0x87   : > { %988 = vmatpush1.bf16.msra.mxu0 %v987_v33  ;;  %926 = vmatprep.subr.bf16.mxu1 %v925_v34  ;;  %v230_v33 = vand.u32 2147483647, %v218_v19  ;;  %v235_v34 = vadd.f32 %v234_v16, %v224_v15  ;;  %v420_v6 = vld [vmem:[#allocation4 + $0x4d8] sm:$0xff]  ;;  %v1023_v7 = vpack.c.bf16 %v415_v4, %v413_v3  ;;  %v421_v15 = vld [vmem:[#allocation4 + $0x4e0] sm:$0xff]  ;;  %v423_v16 = vld [vmem:[#allocation4 + $0x4f0] sm:$0xff]  ;;  %v459_v4 = vlaneseq }
  0x88   : > { %990 = vmatprep.subr.bf16.mxu0 %v989_v38  ;;  %v1445_v38 = vld [vmem:[%s1417_s4 + $0x20] sm:$0xff]  ;;  %v241_v40 = vadd.f32 %v240_v32, %v229_v29  ;;  %v424_v12 = vld [vmem:[#allocation4 + $0x4f8] sm:$0xff]  ;;  %v1031_v20 = vpack.c.bf16 %v423_v16, %v421_v15  ;;  %v434_v29 = vld [vmem:[#allocation4 + $0x548] sm:$0xff] }
  0x89   : > { %v225_v41 = vand.u32 2147483647, %v1445_v38  ;;  %v1029_v14 = vpack.c.bf16 %v424_v12, %v422_v11  ;;  %v425_v22 = vld [vmem:[#allocation4 + $0x500] sm:$0xff]  ;;  %v432_v25 = vld [vmem:[#allocation4 + $0x538] sm:$0xff]  ;;  %vm776_vm2 = vcmp.lt.s32.totalorder %v459_v4, 256 }
  0x8a   : > { %928 = vmatpush1.bf16.msra.mxu1 %v927_v44  ;;  %v406_v44 = vld [vmem:[#allocation4 + $0x468] sm:$0xff]  ;;  %v242_v49 = vadd.f32 %v241_v40, %v230_v33  ;;  %v436_v30 = vld [vmem:[#allocation4 + $0x558] sm:$0xff]  ;;  %v433_v33 = vld [vmem:[#allocation4 + $0x540] sm:$0xff] }
  0x8b   : > { %992 = vmatpush1.bf16.msra.mxu0 %v991_v46  ;;  %930 = vmatprep.subr.bf16.mxu1 %v929_v47  ;;  %v220_v46 = vld [vmem:[%s1417_s4 + $0x58] sm:$0xff]  ;;  %v236_v48 = vadd.f32 %v235_v34, %v225_v41  ;;  %v1041_v32 = vpack.c.bf16 %v436_v30, %v434_v29  ;;  %v435_v34 = vld [vmem:[#allocation4 + $0x550] sm:$0xff]  ;;  %v437_v41 = vld [vmem:[#allocation4 + $0x560] sm:$0xff] }
  0x8c   : > { %994 = vmatprep.subr.bf16.mxu0 %v993_v51  ;;  %v232_v47 = vand.u32 2147483647, %v220_v46  ;;  %v1013_v51 = vpack.c.bf16 %v408_v45, %v406_v44  ;;  %v243_v55 = vadd.f32 %v242_v49, %v231_v43  ;;  %v442_v43 = vld [vmem:[#allocation4 + $0x588] sm:$0xff]  ;;  %v444_v44 = vld [vmem:[#allocation4 + $0x598] sm:$0xff] }
  0x8d   : > { %v446_v49 = vld [vmem:[#allocation4 + $0x5a8] sm:$0xff]  ;;  %v452_v56 = vld [vmem:[#allocation4 + $0x5d8] sm:$0xff] }
  0x8e   : > { %932 = vmatpush1.bf16.msra.mxu1 %v931_v59  ;;  %v244_v58 = vadd.f32 %v243_v55, %v232_v47  ;;  %v1015_v59 = vpack.c.bf16 %v407_v53, %v405_v52  ;;  %v441_v47 = vld [vmem:[#allocation4 + $0x580] sm:$0xff]  ;;  %v450_v55 = vld [vmem:[#allocation4 + $0x5c8] sm:$0xff] }
  0x8f   : > { %996 = vmatpush1.bf16.msra.mxu0 %v995_v61  ;;  %934 = vmatprep.subr.bf16.mxu1 %v933_v62  ;;  %v409_v61 = vld [vmem:[#allocation4 + $0x480] sm:$0xff]  ;;  %v411_v62 = vld [vmem:[#allocation4 + $0x490] sm:$0xff] }
  0x90   : > { %998 = vmatprep.subr.bf16.mxu0 %v997_v2  ;;  %v1019_v1 = vpack.c.bf16 %v411_v62, %v409_v61  ;;  %v1021_v2 = vpack.c.bf16 %v416_v0, %v414_v63  ;;  %v445_v53 = vld [vmem:[#allocation4 + $0x5a0] sm:$0xff]  ;;  %v454_v61 = vld [vmem:[#allocation4 + $0x5e8] sm:$0xff]  ;;  %v456_v62 = vld [vmem:[#allocation4 + $0x5f8] sm:$0xff] }
  0x91   : > { %v1061_v0 = vpack.c.bf16 %v456_v62, %v454_v61 }
  0x92   : > { %936 = vmatpush1.bf16.msra.mxu1 %v935_v8 }
  0x93   : > { %1000 = vmatpush1.bf16.msra.mxu0 %v999_v9  ;;  %1065 = vmatprep.subr.bf16.mxu1 %v1001_v10  ;;  %v417_v9 = vld [vmem:[#allocation4 + $0x4c0] sm:$0xff] }
  0x94   : > { %1002 = vmatprep.subr.bf16.mxu0 %v1001_v10  ;;  %v419_v10 = vld [vmem:[#allocation4 + $0x4d0] sm:$0xff] }
  0x95   : > { %534 = vmatmul.mubr.f32.vlgmr.msra.gmra.mrb[0].mxu1 %v209_v54  ;;  %v237_v54 = vadd.f32 %v236_v48, %v226_v42  ;;  %v1027_v13 = vpack.c.bf16 %v419_v10, %v417_v9  ;;  %v439_v42 = vld [vmem:[#allocation4 + $0x570] sm:$0xff] }
  0x96   : > { %611 = vmatmul.mubr.f32.vlgmr.msra.gmra.mrb[0].mxu0 %v211_v5  ;;  %1081 = vmatpush1.bf16.msra.mxu1 %v1003_v18  ;;  %v418_v5 = vld [vmem:[#allocation4 + $0x4c8] sm:$0xff]  ;;  %v1047_v45 = vpack.c.bf16 %v439_v42, %v437_v41  ;;  %v443_v48 = vld [vmem:[#allocation4 + $0x590] sm:$0xff] }
  0x97   : > { %1004 = vmatpush1.bf16.msra.mxu0 %v1003_v18  ;;  %1066 = vmatprep.subr.bf16.mxu1 %v1005_v24  ;;  %v1025_v8 = vpack.c.bf16 %v420_v6, %v418_v5  ;;  %v428_v18 = vld [vmem:[#allocation4 + $0x518] sm:$0xff]  ;;  %v1456_v5 = vshrl.u32 %v459_v4, 7 }
  0x98   : > { %1006 = vmatprep.subr.bf16.mxu0 %v1005_v24  ;;  %539 = vmatprep.mubr.f32.mxu1 %v216_v17  ;;  %v426_v17 = vld [vmem:[#allocation4 + $0x508] sm:$0xff] }
  0x99   : > { %540 = vmatmul.mubr.f32.gmra.mrb[2].mxu1 %v215_v23  ;;  %616 = vmatprep.mubr.f32.mxu0 %v218_v19  ;;  %v1033_v21 = vpack.c.bf16 %v428_v18, %v426_v17  ;;  %v427_v23 = vld [vmem:[#allocation4 + $0x510] sm:$0xff]  ;;  %v430_v24 = vld [vmem:[#allocation4 + $0x528] sm:$0xff]  ;;  %v461_v6 = vsub.s32 0, %v1456_v5  ;;  %v465_v9 = vsub.s32 1, %v1456_v5 }
  0x9a   : > { %1082 = vmatpush1.bf16.msra.mxu1 %v1007_v35  ;;  %617 = vmatmul.mubr.f32.gmra.mrb[2].mxu0 %v217_v28  ;;  %v1035_v26 = vpack.c.bf16 %v427_v23, %v425_v22  ;;  %v1037_v27 = vpack.c.bf16 %v432_v25, %v430_v24  ;;  %v429_v28 = vld [vmem:[#allocation4 + $0x520] sm:$0xff]  ;;  %v431_v19 = vld [vmem:[#allocation4 + $0x530] sm:$0xff]  ;;  %v1276_v22 = vmov 0.0  }
  0x9b   : > { %1008 = vmatpush1.bf16.msra.mxu0 %v1007_v35  ;;  %1067 = vmatprep.subr.bf16.mxu1 %v1009_v36  ;;  %v1039_v31 = vpack.c.bf16 %v431_v19, %v429_v28  ;;  %v438_v35 = vld [vmem:[#allocation4 + $0x568] sm:$0xff] }
  0x9c   : > { %1010 = vmatprep.subr.bf16.mxu0 %v1009_v36  ;;  %687 = vmatprep.mubr.f32.mxu0 %v214_v37  ;;  %v440_v36 = vld [vmem:[#allocation4 + $0x578] sm:$0xff]  ;;  %v1043_v37 = vpack.c.bf16 %v435_v34, %v433_v33 }
  0x9d   : > { %693 = vmatprep.mubr.f32.mxu1 %v220_v46  ;;  %238 = vadd.xlane.f32.xlu0 %v237_v54  ;;  %v1045_v40 = vpack.c.bf16 %v440_v36, %v438_v35  ;;  %v1049_v46 = vpack.c.bf16 %v444_v44, %v442_v43  ;;  %v447_v54 = vld [vmem:[#allocation4 + $0x5b0] sm:$0xff] }
  0x9e   : > { %1083 = vmatpush1.bf16.msra.mxu1 %v1011_v50  ;;  %v1055_v57 = vpack.c.bf16 %v447_v54, %v445_v53 }
  0x9f   : > { %1012 = vmatpush1.bf16.msra.mxu0 %v1011_v50  ;;  %1068 = vmatprep.subr.bf16.mxu1 %v1013_v51  ;;  %v448_v50 = vld [vmem:[#allocation4 + $0x5b8] sm:$0xff] }
  0xa0   : > { %1014 = vmatprep.subr.bf16.mxu0 %v1013_v51  ;;  %v1051_v51 = vpack.c.bf16 %v443_v48, %v441_v47  ;;  %v1053_v52 = vpack.c.bf16 %v448_v50, %v446_v49 }
  0xa1   : > { %245 = vadd.xlane.f32.xlu0 %v244_v58  ;;  %v1057_v58 = vpack.c.bf16 %v452_v56, %v450_v55 }
  0xa2   : > { %1084 = vmatpush1.bf16.msra.mxu1 %v1015_v59 }
  0xa3   : > { %1016 = vmatpush1.bf16.msra.mxu0 %v1015_v59  ;;  %1069 = vmatprep.subr.bf16.mxu1 %v1017_v60  ;;  %v449_v59 = vld [vmem:[#allocation4 + $0x5c0] sm:$0xff] }
  0xa4   : > { %1018 = vmatprep.subr.bf16.mxu0 %v1017_v60  ;;  %v451_v60 = vld [vmem:[#allocation4 + $0x5d0] sm:$0xff] }
  0xa5   : > { %v1059_v63 = vpack.c.bf16 %v451_v60, %v449_v59 }
  0xa6   : > { %1085 = vmatpush1.bf16.msra.mxu1 %v1019_v1 }
  0xa7   : > { %1020 = vmatpush1.bf16.msra.mxu0 %v1019_v1  ;;  %1070 = vmatprep.subr.bf16.mxu1 %v1021_v2  ;;  %v453_v1 = vld [vmem:[#allocation4 + $0x5e0] sm:$0xff] }
  0xa8   : > { %1022 = vmatprep.subr.bf16.mxu0 %v1021_v2  ;;  %v455_v2 = vld [vmem:[#allocation4 + $0x5f0] sm:$0xff] }
  0xa9   : > { %v1063_v3 = vpack.c.bf16 %v455_v2, %v453_v1  ;;  %v1277_v1 = vmov 1966171168  }
  0xaa   : > { %1086 = vmatpush1.bf16.msra.mxu1 %v1023_v7  ;;  %v744_v2 = vunpack.c.l.s4 %v1277_v1 }
  0xab   : > { %1024 = vmatpush1.bf16.msra.mxu0 %v1023_v7  ;;  %1071 = vmatprep.subr.bf16.mxu1 %v1025_v8  ;;  %v457_v7 = vld [vmem:[%s1485_s2] sm:$0x3] }
  0xac   : > { %1026 = vmatprep.subr.bf16.mxu0 %v1025_v8  ;;  %v462_v11 = vrot.slane %v457_v7, %v461_v6  ;;  %v466_v12 = vrot.slane %v457_v7, %v465_v9 }
  0xae   : > { %1087 = vmatpush1.bf16.msra.mxu1 %v1027_v13 }
  0xaf   : > { %1028 = vmatpush1.bf16.msra.mxu0 %v1027_v13  ;;  %1072 = vmatprep.subr.bf16.mxu1 %v1029_v14 }
  0xb0   : > { %1030 = vmatprep.subr.bf16.mxu0 %v1029_v14 }
  0xb2   : > { %1088 = vmatpush1.bf16.msra.mxu1 %v1031_v20 }
  0xb3   : > { %1032 = vmatpush1.bf16.msra.mxu0 %v1031_v20  ;;  %1073 = vmatprep.subr.bf16.mxu1 %v1033_v21 }
  0xb4   : > { %1034 = vmatprep.subr.bf16.mxu0 %v1033_v21 }
  0xb6   : > { %1089 = vmatpush1.bf16.msra.mxu1 %v1035_v26 }
  0xb7   : > { %1036 = vmatpush1.bf16.msra.mxu0 %v1035_v26  ;;  %1074 = vmatprep.subr.bf16.mxu1 %v1037_v27 }
  0xb8   : > { %1038 = vmatprep.subr.bf16.mxu0 %v1037_v27 }
  0xba   : > { %1090 = vmatpush1.bf16.msra.mxu1 %v1039_v31 }
  0xbb   : > { %1040 = vmatpush1.bf16.msra.mxu0 %v1039_v31  ;;  %1075 = vmatprep.subr.bf16.mxu1 %v1041_v32 }
  0xbc   : > { %1042 = vmatprep.subr.bf16.mxu0 %v1041_v32 }
  0xbe   : > { %1091 = vmatpush1.bf16.msra.mxu1 %v1043_v37 }
  0xbf   : > { %1044 = vmatpush1.bf16.msra.mxu0 %v1043_v37  ;;  %1076 = vmatprep.subr.bf16.mxu1 %v1045_v40 }
  0xc0   : > { %1046 = vmatprep.subr.bf16.mxu0 %v1045_v40 }
  0xc2   : > { %1092 = vmatpush1.bf16.msra.mxu1 %v1047_v45 }
  0xc3   : > { %1048 = vmatpush1.bf16.msra.mxu0 %v1047_v45  ;;  %1077 = vmatprep.subr.bf16.mxu1 %v1049_v46 }
  0xc4   : > { %1050 = vmatprep.subr.bf16.mxu0 %v1049_v46 }
  0xc6   : > { %1093 = vmatpush1.bf16.msra.mxu1 %v1051_v51 }
  0xc7   : > { %1052 = vmatpush1.bf16.msra.mxu0 %v1051_v51  ;;  %1078 = vmatprep.subr.bf16.mxu1 %v1053_v52 }
  0xc8   : > { %1054 = vmatprep.subr.bf16.mxu0 %v1053_v52 }
  0xca   : > { %1094 = vmatpush1.bf16.msra.mxu1 %v1055_v57 }
  0xcb   : > { %1056 = vmatpush1.bf16.msra.mxu0 %v1055_v57  ;;  %1079 = vmatprep.subr.bf16.mxu1 %v1057_v58 }
  0xcc   : > { %1058 = vmatprep.subr.bf16.mxu0 %v1057_v58 }
  0xce   : > { %1095 = vmatpush1.bf16.msra.mxu1 %v1059_v63 }
  0xcf   : > { %1060 = vmatpush1.bf16.msra.mxu0 %v1059_v63  ;;  %1080 = vmatprep.subr.bf16.mxu1 %v1061_v0 }
  0xd0   : > { %1062 = vmatprep.subr.bf16.mxu0 %v1061_v0 }
  0xd2   : > { %1096 = vmatpush1.bf16.msra.mxu1 %v1063_v3 }
  0xd3   : > { %1064 = vmatpush1.bf16.msra.mxu0 %v1063_v3 }
  0xd5   : > { %694 = vmatmul.mubr.f32.vlgmr.msra.gmra.mrb[4].mxu1 %v1448_v39 }
  0xd6   : > { %688 = vmatmul.mubr.f32.vlgmr.msra.gmra.mrb[0].mxu0 %v1445_v38 }
 0x12a   : > { %v239_v20 = vpop.xlane.xlu0 %238 }
 0x12b   : > { %vm247_vm1 = vcmp.ne.f32.partialorder %v239_v20, 0.0 }
 0x12c   : > { %v869_v24 = vsel %vm247_vm1, 1.0, %v1276_v22 }
 0x12d   : > { %v253_v26 = vrot.slane %v869_v24, 4 }
 0x12e   : > { %v246_v21 = vpop.xlane.xlu0 %245 }
 0x12f   : > { %vm248_vm0 = vcmp.ne.f32.partialorder %v246_v21, 0.0  ;;  %v254_v28 = vadd.f32 %v869_v24, %v253_v26 }
 0x130   : > { %v870_v23 = vsel %vm248_vm0, 1.0, %v1276_v22 }
 0x131   : > { %v259_v25 = vrot.slane %v870_v23, 4  ;;  %v255_v29 = vrot.slane %v254_v28, 2 }
 0x133   : > { %v260_v27 = vadd.f32 %v870_v23, %v259_v25  ;;  %v256_v31 = vadd.f32 %v255_v29, %v254_v28 }
 0x135   : > { %v261_v19 = vrot.slane %v260_v27, 2  ;;  %v257_v36 = vrot.slane %v256_v31, 1 }
 0x137   : > { %v262_v30 = vadd.f32 %v261_v19, %v260_v27  ;;  %v258_v50 = vadd.f32 %v257_v36, %v256_v31 }
 0x139   : > { %v263_v33 = vrot.slane %v262_v30, 1 }
 0x13b   : > { %v264_v47 = vadd.f32 %v263_v33, %v262_v30 }
 0x13d   : > { %1168 = vrcp.f32 %v264_v47 }
 0x13e   : > { %1170 = vrcp.f32 %v258_v50 }
 0x168   : > { %v535_v8 = vpop.f32.mrb[0].mxu1 }
 0x169   : > { %v537_v10 = vpop.f32.mrb[1].mxu1  ;;  %v536_v32 = vadd.f32 %v535_v8, %v462_v11 }
 0x16a   : > { %v538_v35 = vadd.f32 %v537_v10, %v466_v12 }
 0x16c   : > { %v541_v13 = vpop.f32.mrb[2].mxu1 }
 0x16d   : > { %v542_v39 = vadd.f32 %v541_v13, %v462_v11  ;;  %v543_v14 = vpop.f32.mrb[3].mxu1  ;;  %v618_v38 = vpop.f32.mrb[2].mxu0  ;;  %v745_v13 = vunpack.c.0.s8 %v744_v2 }
 0x16e   : > { %v544_v15 = vadd.f32 %v543_v14, %v466_v12  ;;  %v620_v16 = vpop.f32.mrb[3].mxu0 }
 0x16f   : > { %v619_v17 = vadd.f32 %v618_v38, %v542_v39 }
 0x170   : > { %v621_v18 = vadd.f32 %v620_v16, %v544_v15  ;;  %v1169_v16 = vpop.eup %1168 }
 0x171   : > { %v1171_v20 = vpop.eup %1170 }
 0x1a8   : > { %v695_v34 = vpop.f32.mrb[4].mxu1 }
 0x1a9   : > { %v689_v37 = vpop.f32.mrb[0].mxu0  ;;  %v696_v40 = vadd.f32 %v695_v34, %v619_v17  ;;  %v697_v41 = vpop.f32.mrb[5].mxu1 }
 0x1aa   : > { %v1098_v42 = vadd.f32 %v689_v37, %v536_v32  ;;  %v691_v43 = vpop.f32.mrb[1].mxu0  ;;  %v698_v44 = vadd.f32 %v697_v41, %v621_v18 }
 0x1ab   : > { %v702_v45 = vmax.f32 %v696_v40, 0.0  ;;  %v1100_v46 = vadd.f32 %v691_v43, %v538_v35 }
 0x1ac   : > { %v700_v48 = vmax.f32 %v1098_v42, 0.0  ;;  %v703_v49 = vmax.f32 %v698_v44, 0.0 }
 0x1ad   : > { %v706_v51 = vmul.f32 %v870_v23, %v702_v45  ;;  %v701_v52 = vmax.f32 %v1100_v46, 0.0 }
 0x1ae   : > { %v704_v53 = vmul.f32 %v869_v24, %v700_v48  ;;  %v707_v54 = vmul.f32 %v870_v23, %v703_v49  ;;  %v748_v23 = vsub.s32 %v745_v13, %v1456_v5 }
 0x1af   : > { %v720_v55 = vrot.slane %v706_v51, 4  ;;  %v705_v56 = vmul.f32 %v869_v24, %v701_v52 }
 0x1b0   : > { %v708_v57 = vrot.slane %v704_v53, 4  ;;  %v726_v58 = vrot.slane %v707_v54, 4 }
 0x1b1   : > { %v721_v59 = vadd.f32 %v720_v55, %v706_v51  ;;  %v714_v60 = vrot.slane %v705_v56, 4 }
 0x1b2   : > { %v709_v61 = vadd.f32 %v708_v57, %v704_v53  ;;  %v727_v62 = vadd.f32 %v726_v58, %v707_v54 }
 0x1b3   : > { %v722_v63 = vrot.slane %v721_v59, 2  ;;  %v715_v0 = vadd.f32 %v714_v60, %v705_v56 }
 0x1b4   : > { %v710_v3 = vrot.slane %v709_v61, 2  ;;  %v728_v6 = vrot.slane %v727_v62, 2 }
 0x1b5   : > { %v723_v7 = vadd.f32 %v722_v63, %v721_v59  ;;  %v716_v8 = vrot.slane %v715_v0, 2 }
 0x1b6   : > { %v711_v9 = vadd.f32 %v710_v3, %v709_v61  ;;  %v729_v10 = vadd.f32 %v728_v6, %v727_v62 }
 0x1b7   : > { %v724_v11 = vrot.slane %v723_v7, 1  ;;  %v717_v12 = vadd.f32 %v716_v8, %v715_v0 }
 0x1b8   : > { %v712_v39 = vrot.slane %v711_v9, 1  ;;  %v730_v14 = vrot.slane %v729_v10, 1 }
 0x1b9   : > { %v725_v38 = vadd.f32 %v724_v11, %v723_v7  ;;  %v718_v15 = vrot.slane %v717_v12, 1 }
 0x1ba   : > { %v713_v17 = vadd.f32 %v712_v39, %v711_v9  ;;  %v731_v18 = vadd.f32 %v730_v14, %v729_v10 }
 0x1bb   : > { %v736_v21 = vmul.f32 %v1169_v16, %v725_v38  ;;  %v719_v22 = vadd.f32 %v718_v15, %v717_v12 }
 0x1bc   : > { %v733_v24 = vmul.f32 %v1171_v20, %v713_v17  ;;  %v737_v25 = vmul.f32 %v1169_v16, %v731_v18 }
 0x1bd   : > { %v734_v26 = vmul.f32 %v1171_v20, %v719_v22 }
 0x1be   : > { %v757_v27 = vcombine.low %v736_v21, %v737_v25 }
 0x1bf   : > { %v742_v28 = vcombine.low %v733_v24, %v734_v26 }
 0x1c0   : > { %v764_v19 = vrot.slane %v757_v27, %v748_v23 }
 0x1c1   : > { %v749_v29 = vrot.slane %v742_v28, %v748_v23 }
 0x1c2   : > { %v771_v30 = vrot.slane %v764_v19, %v748_v23 }
 0x1c3   : > { %v756_v31 = vrot.slane %v749_v29, %v748_v23 }
 0x1c4   : > { %779 = vst.msk [vmem:[%s207_s21 + $0x2] sm:$0x3] %vm776_vm2, %v771_v30 }
 0x1c5   : > { %778 = vst.msk [vmem:[%s207_s21] sm:$0x3] %vm776_vm2, %v756_v31 }
 0x1c6 PF: > { %p14_p6 = scmp.ge.s32.totalorder %s1345_s23, 4   ;;  %s1499_s12 = smov %s1260_s13 }
 0x1c7   : > { %s1500_s13 = smov %s1264_s14  ;;  %s1501_s14 = smov %s1371_s11 }
 0x1c8   : > { %s1502_s15 = smov %s1345_s23  ;;  %16 = sbr.rel (!%p14_p6) target bundleno = 4 (0x4), region = 76 }
 0x1cf   :  { %802 = vsyncpa [#allocation3], 1 }
 0x1d0   :  { %804 = vsyncpa [#allocation3 + $0x1], 1 }
 0x1d1   :  { %805 = vsyncpa [#allocation5], 1 }

</bundles_post_ra>
